<compile_context>
chip_gen: v7x
topology: tpu7x:2x2x1
jax: 0.10.0
libtpu: 0.0.40
codegen_flags: <defaults>
</compile_context>

<pallas_src>
import jax
import jax.numpy as jnp
from jax.experimental import pallas as pl
from jax.experimental.pallas import tpu as pltpu

IN_F, HID_F, OUT_F = 3, 8, 4


def _round_up(n, m):
    return ((n + m - 1) // m) * m


def _default_use_mxu():
    """Use the MXU kernel on v7x; the VPU broadcast-FMA kernel elsewhere."""
    try:
        kind = jax.devices()[0].device_kind.lower()
    except Exception:
        return False
    return ("v7" in kind) or ("tpu7" in kind) or ("7x" in kind)


# --------------------------------------------------------------------------
# Kernel A (v5e / v6e): VPU broadcast-FMA over dense (TBm, 128) slabs.
#   x_ref : (3, TBm, 128) VMEM      o_ref : (4, TBm, 128) VMEM
#   w1    : (8, 3) SMEM  b1 : (8,) SMEM   w2 : (4, 8) SMEM  b2 : (4,) SMEM
# --------------------------------------------------------------------------
def mlp_kernel_vpu(x_ref, w1_ref, b1_ref, w2_ref, b2_ref, o_ref):
    xs = [x_ref[k] for k in range(IN_F)]          # 3 dense (TBm, 128) slabs

    # Layer 1 + ReLU: unrolled broadcast-FMA, bias folded into the init.
    h = []
    for j in range(HID_F):
        acc = xs[0] * w1_ref[j, 0] + b1_ref[j]
        for k in range(1, IN_F):
            acc = acc + xs[k] * w1_ref[j, k]
        h.append(jnp.maximum(acc, 0.0))

    # Layer 2: same pattern; each output row is one tile-aligned dense store.
    for j in range(OUT_F):
        acc = h[0] * w2_ref[j, 0] + b2_ref[j]
        for k in range(1, HID_F):
            acc = acc + h[k] * w2_ref[j, k]
        o_ref[j] = acc.astype(o_ref.dtype)


# --------------------------------------------------------------------------
# Kernel B (v7x): offload both contractions to the MXU.
#   x_ref : (3, TB) VMEM            o_ref : (4, TB) VMEM
#   w1: (8,3) VMEM  b1: (8,1) VMEM  w2: (4,8) VMEM  b2: (4,1) VMEM
# --------------------------------------------------------------------------
def mlp_kernel_mxu(x_ref, w1_ref, b1_ref, w2_ref, b2_ref, o_ref):
    x = x_ref[...]                                                  # (3, TB)
    h = jnp.dot(w1_ref[...], x, preferred_element_type=jnp.float32)
    h = jnp.maximum(h + b1_ref[...], 0.0)                           # (8, TB)
    y = jnp.dot(w2_ref[...], h, preferred_element_type=jnp.float32)
    o_ref[...] = (y + b2_ref[...]).astype(o_ref.dtype)              # (4, TB)


def net_class_forward(x, w1, b1, w2, b2, *, tb=256 * 1024, use_mxu=None,
                      feature_major=False):
    """Forward pass of Net_class.

    x : (B, 3) float (or (3, B) if feature_major=True); w1: (8, 3); b1: (8,);
    w2: (4, 8); b2: (4,)   (PyTorch (out_features, in_features) layout).
    Returns (B, 4) float32 (or (4, B) if feature_major=True).

    tb is the batch-block size in columns (rounded up to a multiple of 1024).
    """
    if use_mxu is None:
        use_mxu = _default_use_mxu()

    # Feature-major (batch-on-lanes) layout inside the kernel.
    x_t = x.astype(jnp.float32) if feature_major else x.astype(jnp.float32).T
    B = x_t.shape[1]

    # Pad only to the 128-lane boundary (NOT to tb); ragged final blocks are
    # handled by Pallas' masked OOB reads/writes.
    B_pad = _round_up(max(B, 1), 128)
    if B_pad != B:
        x_t = jnp.pad(x_t, ((0, 0), (0, B_pad - B)))

    # Batch-block size: multiple of 1024 columns (so the 3-D block's sublane
    # dim is a multiple of 8), clamped to the problem; keep >= 2 blocks when
    # there is enough work so both v7x TensorCores get a share.
    tb = max(1024, _round_up(tb, 1024))
    if B_pad <= tb:
        if B_pad >= 2 * 1024:
            tb_eff = _round_up(B_pad // 2, 1024)       # two blocks
        else:
            tb_eff = B_pad                             # single (full) block
    else:
        tb_eff = tb
    n_blocks = pl.cdiv(B_pad, tb_eff)

    # Explicit scoped-VMEM budget: double-buffered in+out (~28 B/column) plus
    # headroom.  Comfortably under v7x's 64 MiB physical VMEM at default tb.
    bytes_per_col = 4 * (IN_F + OUT_F)
    vmem_limit = min(int(2.5 * bytes_per_col * tb_eff) + (8 << 20), 100 << 20)

    cost = pl.CostEstimate(
        flops=2 * (IN_F * HID_F + HID_F * OUT_F) * B,       # ~112 * B
        transcendentals=0,
        bytes_accessed=bytes_per_col * B,                   # ~28 * B
    )
    cparams = pltpu.CompilerParams(
        dimension_semantics=("parallel",),     # shard batch blocks across TCs
        vmem_limit_bytes=vmem_limit,
    )

    if use_mxu:
        # ---- v7x: MXU path over 2-D (3, TB) / (4, TB) blocks ----
        out_t = pl.pallas_call(
            mlp_kernel_mxu,
            out_shape=jax.ShapeDtypeStruct((OUT_F, B_pad), jnp.float32),
            grid=(n_blocks,),
            in_specs=[
                pl.BlockSpec((IN_F, tb_eff), lambda i: (0, i)),
                pl.BlockSpec((HID_F, IN_F), lambda i: (0, 0)),   # w1 (VMEM)
                pl.BlockSpec((HID_F, 1), lambda i: (0, 0)),      # b1 (VMEM)
                pl.BlockSpec((OUT_F, HID_F), lambda i: (0, 0)),  # w2 (VMEM)
                pl.BlockSpec((OUT_F, 1), lambda i: (0, 0)),      # b2 (VMEM)
            ],
            out_specs=pl.BlockSpec((OUT_F, tb_eff), lambda i: (0, i)),
            compiler_params=cparams,
            cost_estimate=cost,
        )(x_t, w1, b1.reshape(HID_F, 1), w2, b2.reshape(OUT_F, 1))
    else:
        # ---- v5e / v6e: VPU path over dense 3-D (f, TBm, 128) blocks ----
        cols = B_pad // 128
        tbm = tb_eff // 128
        x3 = x_t.reshape(IN_F, cols, 128)      # free: contiguous HBM reshape
        out3 = pl.pallas_call(
            mlp_kernel_vpu,
            out_shape=jax.ShapeDtypeStruct((OUT_F, cols, 128), jnp.float32),
            grid=(n_blocks,),
            in_specs=[
                pl.BlockSpec((IN_F, tbm, 128), lambda i: (0, i, 0)),
                # Tiny weights/biases: whole-array SMEM residents.
                pl.BlockSpec(memory_space=pltpu.MemorySpace.SMEM),
                pl.BlockSpec(memory_space=pltpu.MemorySpace.SMEM),
                pl.BlockSpec(memory_space=pltpu.MemorySpace.SMEM),
                pl.BlockSpec(memory_space=pltpu.MemorySpace.SMEM),
            ],
            out_specs=pl.BlockSpec((OUT_F, tbm, 128), lambda i: (0, i, 0)),
            compiler_params=cparams,
            cost_estimate=cost,
        )(x3, w1, b1, w2, b2)
        out_t = out3.reshape(OUT_F, B_pad)

    out_t = out_t[:, :B]
    return out_t if feature_major else out_t.T


def init_params(key):
    """Deterministic init mimicking PyTorch nn.Linear (uniform +-1/sqrt(fan_in)),
    stored in PyTorch (out_features, in_features) layout."""
    k1, k2, k3, k4 = jax.random.split(key, 4)
    bound1 = 1.0 / jnp.sqrt(3.0)
    bound2 = 1.0 / jnp.sqrt(8.0)
    w1 = jax.random.uniform(k1, (HID_F, IN_F), jnp.float32, -bound1, bound1)
    b1 = jax.random.uniform(k2, (HID_F,), jnp.float32, -bound1, bound1)
    w2 = jax.random.uniform(k3, (OUT_F, HID_F), jnp.float32, -bound2, bound2)
    b2 = jax.random.uniform(k4, (OUT_F,), jnp.float32, -bound2, bound2)
    return w1, b1, w2, b2


if __name__ == "__main__":
    key = jax.random.PRNGKey(0)
    kx, kp = jax.random.split(key)

    batch = 8
    x = jax.random.normal(kx, (batch, IN_F), dtype=jnp.float32)
    w1, b1, w2, b2 = init_params(kp)

    y = net_class_forward(x, w1, b1, w2, b2)   # auto path (VPU, or MXU on v7x)
    jax.block_until_ready(y)

    # Reference check against plain JAX (same math as the PyTorch module).
    ref = jnp.maximum(x @ w1.T + b1, 0.0) @ w2.T + b2
    assert y.shape == (batch, OUT_F)
    # The v7x MXU path rounds f32 matmuls through bf16 passes -> looser tol.
    tol = 3e-2 if _default_use_mxu() else 1e-5
    assert jnp.allclose(y, ref, atol=tol, rtol=tol)

    print("KERNEL_OK")
</pallas_src>

<mosaic_0001>
module attributes {stable_mosaic.version = 11 : i64} {
  func.func @mlp_kernel_vpu(%arg0: i32, %arg1: memref<3x1x128xf32, #tpu.memory_space<vmem>>, %arg2: memref<8x3xf32, #tpu.memory_space<smem>>, %arg3: memref<8xf32, #tpu.memory_space<smem>>, %arg4: memref<4x8xf32, #tpu.memory_space<smem>>, %arg5: memref<4xf32, #tpu.memory_space<smem>>, %arg6: memref<4x1x128xf32, #tpu.memory_space<vmem>>) attributes {dimension_semantics = [#tpu.dimension_semantics<parallel>], iteration_bounds = array<i64: 1>, scalar_prefetch = 0 : i64, scratch_operands = 0 : i64, tpu.core_type = #tpu.core_type<tc>, window_params = [{transform_indices = @transform_0, window_bounds = array<i64: 3, 1, 128>}, {transform_indices = @transform_1, window_bounds = array<i64: 8, 3>}, {transform_indices = @transform_2, window_bounds = array<i64: 8>}, {transform_indices = @transform_3, window_bounds = array<i64: 4, 8>}, {transform_indices = @transform_4, window_bounds = array<i64: 4>}, {transform_indices = @transform_5, window_bounds = array<i64: 4, 1, 128>}]} {
    %c0 = arith.constant 0 : index
    %c0_0 = arith.constant 0 : index
    %c0_1 = arith.constant 0 : index
    %0 = vector.load %arg1[%c0, %c0_0, %c0_1] : memref<3x1x128xf32, #tpu.memory_space<vmem>>, vector<1x1x128xf32>
    %1 = vector.shape_cast %0 : vector<1x1x128xf32> to vector<1x128xf32>
    %c1 = arith.constant 1 : index
    %c0_2 = arith.constant 0 : index
    %c0_3 = arith.constant 0 : index
    %2 = vector.load %arg1[%c1, %c0_2, %c0_3] : memref<3x1x128xf32, #tpu.memory_space<vmem>>, vector<1x1x128xf32>
    %3 = vector.shape_cast %2 : vector<1x1x128xf32> to vector<1x128xf32>
    %c2 = arith.constant 2 : index
    %c0_4 = arith.constant 0 : index
    %c0_5 = arith.constant 0 : index
    %4 = vector.load %arg1[%c2, %c0_4, %c0_5] : memref<3x1x128xf32, #tpu.memory_space<vmem>>, vector<1x1x128xf32>
    %5 = vector.shape_cast %4 : vector<1x1x128xf32> to vector<1x128xf32>
    %c0_6 = arith.constant 0 : index
    %c0_7 = arith.constant 0 : index
    %6 = memref.load %arg2[%c0_6, %c0_7] : memref<8x3xf32, #tpu.memory_space<smem>>
    %7 = vector.broadcast %6 : f32 to vector<1x128xf32>
    %8 = arith.mulf %1, %7 : vector<1x128xf32>
    %c0_8 = arith.constant 0 : index
    %9 = memref.load %arg3[%c0_8] : memref<8xf32, #tpu.memory_space<smem>>
    %10 = vector.broadcast %9 : f32 to vector<1x128xf32>
    %11 = arith.addf %8, %10 : vector<1x128xf32>
    %c0_9 = arith.constant 0 : index
    %c1_10 = arith.constant 1 : index
    %12 = memref.load %arg2[%c0_9, %c1_10] : memref<8x3xf32, #tpu.memory_space<smem>>
    %13 = vector.broadcast %12 : f32 to vector<1x128xf32>
    %14 = arith.mulf %3, %13 : vector<1x128xf32>
    %15 = arith.addf %11, %14 : vector<1x128xf32>
    %c0_11 = arith.constant 0 : index
    %c2_12 = arith.constant 2 : index
    %16 = memref.load %arg2[%c0_11, %c2_12] : memref<8x3xf32, #tpu.memory_space<smem>>
    %17 = vector.broadcast %16 : f32 to vector<1x128xf32>
    %18 = arith.mulf %5, %17 : vector<1x128xf32>
    %19 = arith.addf %15, %18 : vector<1x128xf32>
    %cst = arith.constant 0.000000e+00 : f32
    %20 = vector.broadcast %cst : f32 to vector<1x128xf32>
    %21 = arith.maximumf %19, %20 : vector<1x128xf32>
    %c1_13 = arith.constant 1 : index
    %c0_14 = arith.constant 0 : index
    %22 = memref.load %arg2[%c1_13, %c0_14] : memref<8x3xf32, #tpu.memory_space<smem>>
    %23 = vector.broadcast %22 : f32 to vector<1x128xf32>
    %24 = arith.mulf %1, %23 : vector<1x128xf32>
    %c1_15 = arith.constant 1 : index
    %25 = memref.load %arg3[%c1_15] : memref<8xf32, #tpu.memory_space<smem>>
    %26 = vector.broadcast %25 : f32 to vector<1x128xf32>
    %27 = arith.addf %24, %26 : vector<1x128xf32>
    %c1_16 = arith.constant 1 : index
    %c1_17 = arith.constant 1 : index
    %28 = memref.load %arg2[%c1_16, %c1_17] : memref<8x3xf32, #tpu.memory_space<smem>>
    %29 = vector.broadcast %28 : f32 to vector<1x128xf32>
    %30 = arith.mulf %3, %29 : vector<1x128xf32>
    %31 = arith.addf %27, %30 : vector<1x128xf32>
    %c1_18 = arith.constant 1 : index
    %c2_19 = arith.constant 2 : index
    %32 = memref.load %arg2[%c1_18, %c2_19] : memref<8x3xf32, #tpu.memory_space<smem>>
    %33 = vector.broadcast %32 : f32 to vector<1x128xf32>
    %34 = arith.mulf %5, %33 : vector<1x128xf32>
    %35 = arith.addf %31, %34 : vector<1x128xf32>
    %cst_20 = arith.constant 0.000000e+00 : f32
    %36 = vector.broadcast %cst_20 : f32 to vector<1x128xf32>
    %37 = arith.maximumf %35, %36 : vector<1x128xf32>
    %c2_21 = arith.constant 2 : index
    %c0_22 = arith.constant 0 : index
    %38 = memref.load %arg2[%c2_21, %c0_22] : memref<8x3xf32, #tpu.memory_space<smem>>
    %39 = vector.broadcast %38 : f32 to vector<1x128xf32>
    %40 = arith.mulf %1, %39 : vector<1x128xf32>
    %c2_23 = arith.constant 2 : index
    %41 = memref.load %arg3[%c2_23] : memref<8xf32, #tpu.memory_space<smem>>
    %42 = vector.broadcast %41 : f32 to vector<1x128xf32>
    %43 = arith.addf %40, %42 : vector<1x128xf32>
    %c2_24 = arith.constant 2 : index
    %c1_25 = arith.constant 1 : index
    %44 = memref.load %arg2[%c2_24, %c1_25] : memref<8x3xf32, #tpu.memory_space<smem>>
    %45 = vector.broadcast %44 : f32 to vector<1x128xf32>
    %46 = arith.mulf %3, %45 : vector<1x128xf32>
    %47 = arith.addf %43, %46 : vector<1x128xf32>
    %c2_26 = arith.constant 2 : index
    %c2_27 = arith.constant 2 : index
    %48 = memref.load %arg2[%c2_26, %c2_27] : memref<8x3xf32, #tpu.memory_space<smem>>
    %49 = vector.broadcast %48 : f32 to vector<1x128xf32>
    %50 = arith.mulf %5, %49 : vector<1x128xf32>
    %51 = arith.addf %47, %50 : vector<1x128xf32>
    %cst_28 = arith.constant 0.000000e+00 : f32
    %52 = vector.broadcast %cst_28 : f32 to vector<1x128xf32>
    %53 = arith.maximumf %51, %52 : vector<1x128xf32>
    %c3 = arith.constant 3 : index
    %c0_29 = arith.constant 0 : index
    %54 = memref.load %arg2[%c3, %c0_29] : memref<8x3xf32, #tpu.memory_space<smem>>
    %55 = vector.broadcast %54 : f32 to vector<1x128xf32>
    %56 = arith.mulf %1, %55 : vector<1x128xf32>
    %c3_30 = arith.constant 3 : index
    %57 = memref.load %arg3[%c3_30] : memref<8xf32, #tpu.memory_space<smem>>
    %58 = vector.broadcast %57 : f32 to vector<1x128xf32>
    %59 = arith.addf %56, %58 : vector<1x128xf32>
    %c3_31 = arith.constant 3 : index
    %c1_32 = arith.constant 1 : index
    %60 = memref.load %arg2[%c3_31, %c1_32] : memref<8x3xf32, #tpu.memory_space<smem>>
    %61 = vector.broadcast %60 : f32 to vector<1x128xf32>
    %62 = arith.mulf %3, %61 : vector<1x128xf32>
    %63 = arith.addf %59, %62 : vector<1x128xf32>
    %c3_33 = arith.constant 3 : index
    %c2_34 = arith.constant 2 : index
    %64 = memref.load %arg2[%c3_33, %c2_34] : memref<8x3xf32, #tpu.memory_space<smem>>
    %65 = vector.broadcast %64 : f32 to vector<1x128xf32>
    %66 = arith.mulf %5, %65 : vector<1x128xf32>
    %67 = arith.addf %63, %66 : vector<1x128xf32>
    %cst_35 = arith.constant 0.000000e+00 : f32
    %68 = vector.broadcast %cst_35 : f32 to vector<1x128xf32>
    %69 = arith.maximumf %67, %68 : vector<1x128xf32>
    %c4 = arith.constant 4 : index
    %c0_36 = arith.constant 0 : index
    %70 = memref.load %arg2[%c4, %c0_36] : memref<8x3xf32, #tpu.memory_space<smem>>
    %71 = vector.broadcast %70 : f32 to vector<1x128xf32>
    %72 = arith.mulf %1, %71 : vector<1x128xf32>
    %c4_37 = arith.constant 4 : index
    %73 = memref.load %arg3[%c4_37] : memref<8xf32, #tpu.memory_space<smem>>
    %74 = vector.broadcast %73 : f32 to vector<1x128xf32>
    %75 = arith.addf %72, %74 : vector<1x128xf32>
    %c4_38 = arith.constant 4 : index
    %c1_39 = arith.constant 1 : index
    %76 = memref.load %arg2[%c4_38, %c1_39] : memref<8x3xf32, #tpu.memory_space<smem>>
    %77 = vector.broadcast %76 : f32 to vector<1x128xf32>
    %78 = arith.mulf %3, %77 : vector<1x128xf32>
    %79 = arith.addf %75, %78 : vector<1x128xf32>
    %c4_40 = arith.constant 4 : index
    %c2_41 = arith.constant 2 : index
    %80 = memref.load %arg2[%c4_40, %c2_41] : memref<8x3xf32, #tpu.memory_space<smem>>
    %81 = vector.broadcast %80 : f32 to vector<1x128xf32>
    %82 = arith.mulf %5, %81 : vector<1x128xf32>
    %83 = arith.addf %79, %82 : vector<1x128xf32>
    %cst_42 = arith.constant 0.000000e+00 : f32
    %84 = vector.broadcast %cst_42 : f32 to vector<1x128xf32>
    %85 = arith.maximumf %83, %84 : vector<1x128xf32>
    %c5 = arith.constant 5 : index
    %c0_43 = arith.constant 0 : index
    %86 = memref.load %arg2[%c5, %c0_43] : memref<8x3xf32, #tpu.memory_space<smem>>
    %87 = vector.broadcast %86 : f32 to vector<1x128xf32>
    %88 = arith.mulf %1, %87 : vector<1x128xf32>
    %c5_44 = arith.constant 5 : index
    %89 = memref.load %arg3[%c5_44] : memref<8xf32, #tpu.memory_space<smem>>
    %90 = vector.broadcast %89 : f32 to vector<1x128xf32>
    %91 = arith.addf %88, %90 : vector<1x128xf32>
    %c5_45 = arith.constant 5 : index
    %c1_46 = arith.constant 1 : index
    %92 = memref.load %arg2[%c5_45, %c1_46] : memref<8x3xf32, #tpu.memory_space<smem>>
    %93 = vector.broadcast %92 : f32 to vector<1x128xf32>
    %94 = arith.mulf %3, %93 : vector<1x128xf32>
    %95 = arith.addf %91, %94 : vector<1x128xf32>
    %c5_47 = arith.constant 5 : index
    %c2_48 = arith.constant 2 : index
    %96 = memref.load %arg2[%c5_47, %c2_48] : memref<8x3xf32, #tpu.memory_space<smem>>
    %97 = vector.broadcast %96 : f32 to vector<1x128xf32>
    %98 = arith.mulf %5, %97 : vector<1x128xf32>
    %99 = arith.addf %95, %98 : vector<1x128xf32>
    %cst_49 = arith.constant 0.000000e+00 : f32
    %100 = vector.broadcast %cst_49 : f32 to vector<1x128xf32>
    %101 = arith.maximumf %99, %100 : vector<1x128xf32>
    %c6 = arith.constant 6 : index
    %c0_50 = arith.constant 0 : index
    %102 = memref.load %arg2[%c6, %c0_50] : memref<8x3xf32, #tpu.memory_space<smem>>
    %103 = vector.broadcast %102 : f32 to vector<1x128xf32>
    %104 = arith.mulf %1, %103 : vector<1x128xf32>
    %c6_51 = arith.constant 6 : index
    %105 = memref.load %arg3[%c6_51] : memref<8xf32, #tpu.memory_space<smem>>
    %106 = vector.broadcast %105 : f32 to vector<1x128xf32>
    %107 = arith.addf %104, %106 : vector<1x128xf32>
    %c6_52 = arith.constant 6 : index
    %c1_53 = arith.constant 1 : index
    %108 = memref.load %arg2[%c6_52, %c1_53] : memref<8x3xf32, #tpu.memory_space<smem>>
    %109 = vector.broadcast %108 : f32 to vector<1x128xf32>
    %110 = arith.mulf %3, %109 : vector<1x128xf32>
    %111 = arith.addf %107, %110 : vector<1x128xf32>
    %c6_54 = arith.constant 6 : index
    %c2_55 = arith.constant 2 : index
    %112 = memref.load %arg2[%c6_54, %c2_55] : memref<8x3xf32, #tpu.memory_space<smem>>
    %113 = vector.broadcast %112 : f32 to vector<1x128xf32>
    %114 = arith.mulf %5, %113 : vector<1x128xf32>
    %115 = arith.addf %111, %114 : vector<1x128xf32>
    %cst_56 = arith.constant 0.000000e+00 : f32
    %116 = vector.broadcast %cst_56 : f32 to vector<1x128xf32>
    %117 = arith.maximumf %115, %116 : vector<1x128xf32>
    %c7 = arith.constant 7 : index
    %c0_57 = arith.constant 0 : index
    %118 = memref.load %arg2[%c7, %c0_57] : memref<8x3xf32, #tpu.memory_space<smem>>
    %119 = vector.broadcast %118 : f32 to vector<1x128xf32>
    %120 = arith.mulf %1, %119 : vector<1x128xf32>
    %c7_58 = arith.constant 7 : index
    %121 = memref.load %arg3[%c7_58] : memref<8xf32, #tpu.memory_space<smem>>
    %122 = vector.broadcast %121 : f32 to vector<1x128xf32>
    %123 = arith.addf %120, %122 : vector<1x128xf32>
    %c7_59 = arith.constant 7 : index
    %c1_60 = arith.constant 1 : index
    %124 = memref.load %arg2[%c7_59, %c1_60] : memref<8x3xf32, #tpu.memory_space<smem>>
    %125 = vector.broadcast %124 : f32 to vector<1x128xf32>
    %126 = arith.mulf %3, %125 : vector<1x128xf32>
    %127 = arith.addf %123, %126 : vector<1x128xf32>
    %c7_61 = arith.constant 7 : index
    %c2_62 = arith.constant 2 : index
    %128 = memref.load %arg2[%c7_61, %c2_62] : memref<8x3xf32, #tpu.memory_space<smem>>
    %129 = vector.broadcast %128 : f32 to vector<1x128xf32>
    %130 = arith.mulf %5, %129 : vector<1x128xf32>
    %131 = arith.addf %127, %130 : vector<1x128xf32>
    %cst_63 = arith.constant 0.000000e+00 : f32
    %132 = vector.broadcast %cst_63 : f32 to vector<1x128xf32>
    %133 = arith.maximumf %131, %132 : vector<1x128xf32>
    %c0_64 = arith.constant 0 : index
    %c0_65 = arith.constant 0 : index
    %134 = memref.load %arg4[%c0_64, %c0_65] : memref<4x8xf32, #tpu.memory_space<smem>>
    %135 = vector.broadcast %134 : f32 to vector<1x128xf32>
    %136 = arith.mulf %21, %135 : vector<1x128xf32>
    %c0_66 = arith.constant 0 : index
    %137 = memref.load %arg5[%c0_66] : memref<4xf32, #tpu.memory_space<smem>>
    %138 = vector.broadcast %137 : f32 to vector<1x128xf32>
    %139 = arith.addf %136, %138 : vector<1x128xf32>
    %c0_67 = arith.constant 0 : index
    %c1_68 = arith.constant 1 : index
    %140 = memref.load %arg4[%c0_67, %c1_68] : memref<4x8xf32, #tpu.memory_space<smem>>
    %141 = vector.broadcast %140 : f32 to vector<1x128xf32>
    %142 = arith.mulf %37, %141 : vector<1x128xf32>
    %143 = arith.addf %139, %142 : vector<1x128xf32>
    %c0_69 = arith.constant 0 : index
    %c2_70 = arith.constant 2 : index
    %144 = memref.load %arg4[%c0_69, %c2_70] : memref<4x8xf32, #tpu.memory_space<smem>>
    %145 = vector.broadcast %144 : f32 to vector<1x128xf32>
    %146 = arith.mulf %53, %145 : vector<1x128xf32>
    %147 = arith.addf %143, %146 : vector<1x128xf32>
    %c0_71 = arith.constant 0 : index
    %c3_72 = arith.constant 3 : index
    %148 = memref.load %arg4[%c0_71, %c3_72] : memref<4x8xf32, #tpu.memory_space<smem>>
    %149 = vector.broadcast %148 : f32 to vector<1x128xf32>
    %150 = arith.mulf %69, %149 : vector<1x128xf32>
    %151 = arith.addf %147, %150 : vector<1x128xf32>
    %c0_73 = arith.constant 0 : index
    %c4_74 = arith.constant 4 : index
    %152 = memref.load %arg4[%c0_73, %c4_74] : memref<4x8xf32, #tpu.memory_space<smem>>
    %153 = vector.broadcast %152 : f32 to vector<1x128xf32>
    %154 = arith.mulf %85, %153 : vector<1x128xf32>
    %155 = arith.addf %151, %154 : vector<1x128xf32>
    %c0_75 = arith.constant 0 : index
    %c5_76 = arith.constant 5 : index
    %156 = memref.load %arg4[%c0_75, %c5_76] : memref<4x8xf32, #tpu.memory_space<smem>>
    %157 = vector.broadcast %156 : f32 to vector<1x128xf32>
    %158 = arith.mulf %101, %157 : vector<1x128xf32>
    %159 = arith.addf %155, %158 : vector<1x128xf32>
    %c0_77 = arith.constant 0 : index
    %c6_78 = arith.constant 6 : index
    %160 = memref.load %arg4[%c0_77, %c6_78] : memref<4x8xf32, #tpu.memory_space<smem>>
    %161 = vector.broadcast %160 : f32 to vector<1x128xf32>
    %162 = arith.mulf %117, %161 : vector<1x128xf32>
    %163 = arith.addf %159, %162 : vector<1x128xf32>
    %c0_79 = arith.constant 0 : index
    %c7_80 = arith.constant 7 : index
    %164 = memref.load %arg4[%c0_79, %c7_80] : memref<4x8xf32, #tpu.memory_space<smem>>
    %165 = vector.broadcast %164 : f32 to vector<1x128xf32>
    %166 = arith.mulf %133, %165 : vector<1x128xf32>
    %167 = arith.addf %163, %166 : vector<1x128xf32>
    %c0_81 = arith.constant 0 : index
    %c0_82 = arith.constant 0 : index
    %c0_83 = arith.constant 0 : index
    %168 = vector.load %arg6[%c0_81, %c0_82, %c0_83] : memref<4x1x128xf32, #tpu.memory_space<vmem>>, vector<1x1x128xf32>
    %169 = vector.shape_cast %168 : vector<1x1x128xf32> to vector<1x128xf32>
    %170 = vector.shape_cast %167 : vector<1x128xf32> to vector<1x1x128xf32>
    tpu.vector_store %arg6[%c0_81, %c0_82, %c0_83], %170 {strides = array<i32>} : memref<4x1x128xf32, #tpu.memory_space<vmem>>, vector<1x1x128xf32>,
    %c1_84 = arith.constant 1 : index
    %c0_85 = arith.constant 0 : index
    %171 = memref.load %arg4[%c1_84, %c0_85] : memref<4x8xf32, #tpu.memory_space<smem>>
    %172 = vector.broadcast %171 : f32 to vector<1x128xf32>
    %173 = arith.mulf %21, %172 : vector<1x128xf32>
    %c1_86 = arith.constant 1 : index
    %174 = memref.load %arg5[%c1_86] : memref<4xf32, #tpu.memory_space<smem>>
    %175 = vector.broadcast %174 : f32 to vector<1x128xf32>
    %176 = arith.addf %173, %175 : vector<1x128xf32>
    %c1_87 = arith.constant 1 : index
    %c1_88 = arith.constant 1 : index
    %177 = memref.load %arg4[%c1_87, %c1_88] : memref<4x8xf32, #tpu.memory_space<smem>>
    %178 = vector.broadcast %177 : f32 to vector<1x128xf32>
    %179 = arith.mulf %37, %178 : vector<1x128xf32>
    %180 = arith.addf %176, %179 : vector<1x128xf32>
    %c1_89 = arith.constant 1 : index
    %c2_90 = arith.constant 2 : index
    %181 = memref.load %arg4[%c1_89, %c2_90] : memref<4x8xf32, #tpu.memory_space<smem>>
    %182 = vector.broadcast %181 : f32 to vector<1x128xf32>
    %183 = arith.mulf %53, %182 : vector<1x128xf32>
    %184 = arith.addf %180, %183 : vector<1x128xf32>
    %c1_91 = arith.constant 1 : index
    %c3_92 = arith.constant 3 : index
    %185 = memref.load %arg4[%c1_91, %c3_92] : memref<4x8xf32, #tpu.memory_space<smem>>
    %186 = vector.broadcast %185 : f32 to vector<1x128xf32>
    %187 = arith.mulf %69, %186 : vector<1x128xf32>
    %188 = arith.addf %184, %187 : vector<1x128xf32>
    %c1_93 = arith.constant 1 : index
    %c4_94 = arith.constant 4 : index
    %189 = memref.load %arg4[%c1_93, %c4_94] : memref<4x8xf32, #tpu.memory_space<smem>>
    %190 = vector.broadcast %189 : f32 to vector<1x128xf32>
    %191 = arith.mulf %85, %190 : vector<1x128xf32>
    %192 = arith.addf %188, %191 : vector<1x128xf32>
    %c1_95 = arith.constant 1 : index
    %c5_96 = arith.constant 5 : index
    %193 = memref.load %arg4[%c1_95, %c5_96] : memref<4x8xf32, #tpu.memory_space<smem>>
    %194 = vector.broadcast %193 : f32 to vector<1x128xf32>
    %195 = arith.mulf %101, %194 : vector<1x128xf32>
    %196 = arith.addf %192, %195 : vector<1x128xf32>
    %c1_97 = arith.constant 1 : index
    %c6_98 = arith.constant 6 : index
    %197 = memref.load %arg4[%c1_97, %c6_98] : memref<4x8xf32, #tpu.memory_space<smem>>
    %198 = vector.broadcast %197 : f32 to vector<1x128xf32>
    %199 = arith.mulf %117, %198 : vector<1x128xf32>
    %200 = arith.addf %196, %199 : vector<1x128xf32>
    %c1_99 = arith.constant 1 : index
    %c7_100 = arith.constant 7 : index
    %201 = memref.load %arg4[%c1_99, %c7_100] : memref<4x8xf32, #tpu.memory_space<smem>>
    %202 = vector.broadcast %201 : f32 to vector<1x128xf32>
    %203 = arith.mulf %133, %202 : vector<1x128xf32>
    %204 = arith.addf %200, %203 : vector<1x128xf32>
    %c1_101 = arith.constant 1 : index
    %c0_102 = arith.constant 0 : index
    %c0_103 = arith.constant 0 : index
    %205 = vector.load %arg6[%c1_101, %c0_102, %c0_103] : memref<4x1x128xf32, #tpu.memory_space<vmem>>, vector<1x1x128xf32>
    %206 = vector.shape_cast %205 : vector<1x1x128xf32> to vector<1x128xf32>
    %207 = vector.shape_cast %204 : vector<1x128xf32> to vector<1x1x128xf32>
    tpu.vector_store %arg6[%c1_101, %c0_102, %c0_103], %207 {strides = array<i32>} : memref<4x1x128xf32, #tpu.memory_space<vmem>>, vector<1x1x128xf32>,
    %c2_104 = arith.constant 2 : index
    %c0_105 = arith.constant 0 : index
    %208 = memref.load %arg4[%c2_104, %c0_105] : memref<4x8xf32, #tpu.memory_space<smem>>
    %209 = vector.broadcast %208 : f32 to vector<1x128xf32>
    %210 = arith.mulf %21, %209 : vector<1x128xf32>
    %c2_106 = arith.constant 2 : index
    %211 = memref.load %arg5[%c2_106] : memref<4xf32, #tpu.memory_space<smem>>
    %212 = vector.broadcast %211 : f32 to vector<1x128xf32>
    %213 = arith.addf %210, %212 : vector<1x128xf32>
    %c2_107 = arith.constant 2 : index
    %c1_108 = arith.constant 1 : index
    %214 = memref.load %arg4[%c2_107, %c1_108] : memref<4x8xf32, #tpu.memory_space<smem>>
    %215 = vector.broadcast %214 : f32 to vector<1x128xf32>
    %216 = arith.mulf %37, %215 : vector<1x128xf32>
    %217 = arith.addf %213, %216 : vector<1x128xf32>
    %c2_109 = arith.constant 2 : index
    %c2_110 = arith.constant 2 : index
    %218 = memref.load %arg4[%c2_109, %c2_110] : memref<4x8xf32, #tpu.memory_space<smem>>
    %219 = vector.broadcast %218 : f32 to vector<1x128xf32>
    %220 = arith.mulf %53, %219 : vector<1x128xf32>
    %221 = arith.addf %217, %220 : vector<1x128xf32>
    %c2_111 = arith.constant 2 : index
    %c3_112 = arith.constant 3 : index
    %222 = memref.load %arg4[%c2_111, %c3_112] : memref<4x8xf32, #tpu.memory_space<smem>>
    %223 = vector.broadcast %222 : f32 to vector<1x128xf32>
    %224 = arith.mulf %69, %223 : vector<1x128xf32>
    %225 = arith.addf %221, %224 : vector<1x128xf32>
    %c2_113 = arith.constant 2 : index
    %c4_114 = arith.constant 4 : index
    %226 = memref.load %arg4[%c2_113, %c4_114] : memref<4x8xf32, #tpu.memory_space<smem>>
    %227 = vector.broadcast %226 : f32 to vector<1x128xf32>
    %228 = arith.mulf %85, %227 : vector<1x128xf32>
    %229 = arith.addf %225, %228 : vector<1x128xf32>
    %c2_115 = arith.constant 2 : index
    %c5_116 = arith.constant 5 : index
    %230 = memref.load %arg4[%c2_115, %c5_116] : memref<4x8xf32, #tpu.memory_space<smem>>
    %231 = vector.broadcast %230 : f32 to vector<1x128xf32>
    %232 = arith.mulf %101, %231 : vector<1x128xf32>
    %233 = arith.addf %229, %232 : vector<1x128xf32>
    %c2_117 = arith.constant 2 : index
    %c6_118 = arith.constant 6 : index
    %234 = memref.load %arg4[%c2_117, %c6_118] : memref<4x8xf32, #tpu.memory_space<smem>>
    %235 = vector.broadcast %234 : f32 to vector<1x128xf32>
    %236 = arith.mulf %117, %235 : vector<1x128xf32>
    %237 = arith.addf %233, %236 : vector<1x128xf32>
    %c2_119 = arith.constant 2 : index
    %c7_120 = arith.constant 7 : index
    %238 = memref.load %arg4[%c2_119, %c7_120] : memref<4x8xf32, #tpu.memory_space<smem>>
    %239 = vector.broadcast %238 : f32 to vector<1x128xf32>
    %240 = arith.mulf %133, %239 : vector<1x128xf32>
    %241 = arith.addf %237, %240 : vector<1x128xf32>
    %c2_121 = arith.constant 2 : index
    %c0_122 = arith.constant 0 : index
    %c0_123 = arith.constant 0 : index
    %242 = vector.load %arg6[%c2_121, %c0_122, %c0_123] : memref<4x1x128xf32, #tpu.memory_space<vmem>>, vector<1x1x128xf32>
    %243 = vector.shape_cast %242 : vector<1x1x128xf32> to vector<1x128xf32>
    %244 = vector.shape_cast %241 : vector<1x128xf32> to vector<1x1x128xf32>
    tpu.vector_store %arg6[%c2_121, %c0_122, %c0_123], %244 {strides = array<i32>} : memref<4x1x128xf32, #tpu.memory_space<vmem>>, vector<1x1x128xf32>,
    %c3_124 = arith.constant 3 : index
    %c0_125 = arith.constant 0 : index
    %245 = memref.load %arg4[%c3_124, %c0_125] : memref<4x8xf32, #tpu.memory_space<smem>>
    %246 = vector.broadcast %245 : f32 to vector<1x128xf32>
    %247 = arith.mulf %21, %246 : vector<1x128xf32>
    %c3_126 = arith.constant 3 : index
    %248 = memref.load %arg5[%c3_126] : memref<4xf32, #tpu.memory_space<smem>>
    %249 = vector.broadcast %248 : f32 to vector<1x128xf32>
    %250 = arith.addf %247, %249 : vector<1x128xf32>
    %c3_127 = arith.constant 3 : index
    %c1_128 = arith.constant 1 : index
    %251 = memref.load %arg4[%c3_127, %c1_128] : memref<4x8xf32, #tpu.memory_space<smem>>
    %252 = vector.broadcast %251 : f32 to vector<1x128xf32>
    %253 = arith.mulf %37, %252 : vector<1x128xf32>
    %254 = arith.addf %250, %253 : vector<1x128xf32>
    %c3_129 = arith.constant 3 : index
    %c2_130 = arith.constant 2 : index
    %255 = memref.load %arg4[%c3_129, %c2_130] : memref<4x8xf32, #tpu.memory_space<smem>>
    %256 = vector.broadcast %255 : f32 to vector<1x128xf32>
    %257 = arith.mulf %53, %256 : vector<1x128xf32>
    %258 = arith.addf %254, %257 : vector<1x128xf32>
    %c3_131 = arith.constant 3 : index
    %c3_132 = arith.constant 3 : index
    %259 = memref.load %arg4[%c3_131, %c3_132] : memref<4x8xf32, #tpu.memory_space<smem>>
    %260 = vector.broadcast %259 : f32 to vector<1x128xf32>
    %261 = arith.mulf %69, %260 : vector<1x128xf32>
    %262 = arith.addf %258, %261 : vector<1x128xf32>
    %c3_133 = arith.constant 3 : index
    %c4_134 = arith.constant 4 : index
    %263 = memref.load %arg4[%c3_133, %c4_134] : memref<4x8xf32, #tpu.memory_space<smem>>
    %264 = vector.broadcast %263 : f32 to vector<1x128xf32>
    %265 = arith.mulf %85, %264 : vector<1x128xf32>
    %266 = arith.addf %262, %265 : vector<1x128xf32>
    %c3_135 = arith.constant 3 : index
    %c5_136 = arith.constant 5 : index
    %267 = memref.load %arg4[%c3_135, %c5_136] : memref<4x8xf32, #tpu.memory_space<smem>>
    %268 = vector.broadcast %267 : f32 to vector<1x128xf32>
    %269 = arith.mulf %101, %268 : vector<1x128xf32>
    %270 = arith.addf %266, %269 : vector<1x128xf32>
    %c3_137 = arith.constant 3 : index
    %c6_138 = arith.constant 6 : index
    %271 = memref.load %arg4[%c3_137, %c6_138] : memref<4x8xf32, #tpu.memory_space<smem>>
    %272 = vector.broadcast %271 : f32 to vector<1x128xf32>
    %273 = arith.mulf %117, %272 : vector<1x128xf32>
    %274 = arith.addf %270, %273 : vector<1x128xf32>
    %c3_139 = arith.constant 3 : index
    %c7_140 = arith.constant 7 : index
    %275 = memref.load %arg4[%c3_139, %c7_140] : memref<4x8xf32, #tpu.memory_space<smem>>
    %276 = vector.broadcast %275 : f32 to vector<1x128xf32>
    %277 = arith.mulf %133, %276 : vector<1x128xf32>
    %278 = arith.addf %274, %277 : vector<1x128xf32>
    %c3_141 = arith.constant 3 : index
    %c0_142 = arith.constant 0 : index
    %c0_143 = arith.constant 0 : index
    %279 = vector.load %arg6[%c3_141, %c0_142, %c0_143] : memref<4x1x128xf32, #tpu.memory_space<vmem>>, vector<1x1x128xf32>
    %280 = vector.shape_cast %279 : vector<1x1x128xf32> to vector<1x128xf32>
    %281 = vector.shape_cast %278 : vector<1x128xf32> to vector<1x1x128xf32>
    tpu.vector_store %arg6[%c3_141, %c0_142, %c0_143], %281 {strides = array<i32>} : memref<4x1x128xf32, #tpu.memory_space<vmem>>, vector<1x1x128xf32>,
    return
  }
  func.func @transform_0(%arg0: i32) -> (i32, i32, i32) {
    %c0_i32 = arith.constant 0 : i32
    %c0_i32_0 = arith.constant 0 : i32
    %c0_i32_1 = arith.constant 0 : i32
    return %c0_i32, %arg0, %c0_i32_0 : i32, i32, i32
  }
  func.func @transform_1(%arg0: i32) -> (i32, i32) {
    %c0_i32 = arith.constant 0 : i32
    %c0_i32_0 = arith.constant 0 : i32
    %c0_i32_1 = arith.constant 0 : i32
    return %c0_i32, %c0_i32_0 : i32, i32
  }
  func.func @transform_2(%arg0: i32) -> i32 {
    %c0_i32 = arith.constant 0 : i32
    %c0_i32_0 = arith.constant 0 : i32
    return %c0_i32 : i32
  }
  func.func @transform_3(%arg0: i32) -> (i32, i32) {
    %c0_i32 = arith.constant 0 : i32
    %c0_i32_0 = arith.constant 0 : i32
    %c0_i32_1 = arith.constant 0 : i32
    return %c0_i32, %c0_i32_0 : i32, i32
  }
  func.func @transform_4(%arg0: i32) -> i32 {
    %c0_i32 = arith.constant 0 : i32
    %c0_i32_0 = arith.constant 0 : i32
    return %c0_i32 : i32
  }
  func.func @transform_5(%arg0: i32) -> (i32, i32, i32) {
    %c0_i32 = arith.constant 0 : i32
    %c0_i32_0 = arith.constant 0 : i32
    %c0_i32_1 = arith.constant 0 : i32
    return %c0_i32, %arg0, %c0_i32_0 : i32, i32, i32
  }
}

</mosaic_0001>

<bundles_post_ra>
// kernel: tpu_custom_call.1
= control target key start
LH: loop header
LB: loop body
LE: loop exit
PB: predicated region body
PF: predicated region fallthrough
CT: control target
= control target key end

     0   :  { %10 = vsyncpa [#allocation4], 0  ;;  %s835_s0 = inlined_call_operand.vmem [shape: f32[3,1,128], index: 0, kind: input, shape index: {}]   ;;  %s836_s1 = inlined_call_operand.vmem [shape: f32[8,3], index: 1, kind: input, shape index: {}]   ;;  %s837_s2 = inlined_call_operand.vmem [shape: f32[8], index: 2, kind: input, shape index: {}]   ;;  %s838_s3 = inlined_call_operand.vmem [shape: f32[4,8], index: 3, kind: input, shape index: {}]   ;;  %s839_s4 = inlined_call_operand.vmem [shape: f32[4], index: 4, kind: input, shape index: {}]   ;;  %s840_s5 = inlined_call_operand.hbm [shape: f32[4,1,128], index: 5, kind: output, shape index: {}]  }
   0x1   :  { %11 = vsyncpa [#allocation6], 0 }
   0x2   :  { %12 = vsyncpa [#allocation9], 0  ;;  %s32_s20 = sshll.u32 %s837_s2, 4  ;;  %s33_s20 = int_to_ptr.vmem [resolvable:$true] %s32_s20 }
   0x3   :  { %13 = vsyncpa [#allocation3], 0  ;;  %s22_s23 = sshll.u32 %s836_s1, 4  ;;  %s429_s24 = scalar_lea.vmem %s33_s20, 16  ;;  %s23_s23 = int_to_ptr.vmem [resolvable:$true] %s22_s23 }
   0x4   :  { %p430_p0 = scmp.ne.s32.totalorder %s33_s20, %s429_s24  ;;  %p434_p1 = scmp.lt.s32.totalorder %s33_s20, %s33_s20 }
   0x5   :  { %p435_p2 = scmp.lt.s32.totalorder %s429_s24, %s429_s24 }
   0x7   :  { %p436_p3 = por %p435_p2, %p434_p1 }
   0x9   :  { %p437_p4 = pnand %p436_p3, %p430_p0 }
   0xb   :  { %440 = shalt.err (!%p437_p4)
}
   0xc   :  { %s507_s25 = smov [#allocation5]   ;;  %s441_s26 = scalar_lea.vmem %s23_s23, 128 }
   0xd   :  { %35 = dma.vmem_to_smem %s33_s20, 16, %s507_s25, [#allocation6]  }
   0xe   :  { %p442_p5 = scmp.ne.s32.totalorder %s23_s23, %s441_s26  ;;  %p446_p6 = scmp.lt.s32.totalorder %s23_s23, %s23_s23 }
   0xf   :  { %p447_p7 = scmp.lt.s32.totalorder %s441_s26, %s441_s26 }
  0x11   :  { %p448_p8 = por %p447_p7, %p446_p6 }
  0x13   :  { %p449_p9 = pnand %p448_p8, %p442_p5 }
  0x15   :  { %452 = shalt.err (!%p449_p9)
}
  0x16   :  { %s508_s2 = smov [#allocation2]   ;;  %s42_s28 = sshll.u32 %s838_s3, 4  ;;  %s43_s28 = int_to_ptr.vmem [resolvable:$true] %s42_s28 }
  0x17   :  { %25 = dma.vmem_to_smem %s23_s23, 128, %s508_s2, [#allocation4]  }
  0x18   :  { %s52_s6 = sshll.u32 %s839_s4, 4  ;;  %s453_s7 = scalar_lea.vmem %s43_s28, 64  ;;  %s53_s6 = int_to_ptr.vmem [resolvable:$true] %s52_s6 }
  0x19   :  { %p454_p10 = scmp.ne.s32.totalorder %s43_s28, %s453_s7  ;;  %p458_p11 = scmp.lt.s32.totalorder %s43_s28, %s43_s28 }
  0x1a   :  { %p459_p12 = scmp.lt.s32.totalorder %s453_s7, %s453_s7 }
  0x1c   :  { %p460_p13 = por %p459_p12, %p458_p11 }
  0x1e   :  { %p461_p0 = pnand %p460_p13, %p454_p10 }
  0x20   :  { %464 = shalt.err (!%p461_p0)
}
  0x21   :  { %s509_s8 = smov [#allocation7]   ;;  %s465_s9 = scalar_lea.vmem %s53_s6, 16 }
  0x22   :  { %45 = dma.vmem_to_smem %s43_s28, 64, %s509_s8, [#allocation6]  }
  0x23   :  { %p466_p1 = scmp.ne.s32.totalorder %s53_s6, %s465_s9  ;;  %p470_p2 = scmp.lt.s32.totalorder %s53_s6, %s53_s6 }
  0x24   :  { %p471_p3 = scmp.lt.s32.totalorder %s465_s9, %s465_s9 }
  0x26   :  { %p472_p4 = por %p471_p3, %p470_p2 }
  0x28   :  { %p473_p5 = pnand %p472_p4, %p466_p1 }
  0x2a   :  { %476 = shalt.err (!%p473_p5)
}
  0x2b   :  { %s510_s3 = smov [#allocation8]  }
  0x2c   :  { %55 = dma.vmem_to_smem %s53_s6, 16, %s510_s3, [#allocation9]  }
  0x2d   :  { %499 = dma.done.wait [#allocation4], 128  }
  0x2e   :  { %500 = vsyncadd [#allocation4], 4294967168 }
  0x2f   :  { %501 = dma.done.wait [#allocation6], 80  }
  0x30   :  { %502 = vsyncadd [#allocation6], 4294967216 }
  0x31   :  { %503 = dma.done.wait [#allocation9], 16  }
  0x32   :  { %504 = vsyncadd [#allocation9], 4294967280 }
  0x33   :  { %68 = sfence }
  0x34   :  { %s74_s4 = sld [smem:[#allocation2]]  ;;  %s358_s11 = sld [smem:[#allocation2 + $0x1]]  ;;  %v561_v0 = vld [vmem:[%s835_s0] sm:$0x1]  ;;  %v566_v1 = vld [vmem:[%s835_s0 + $0x1] sm:$0x1] }
  0x35   :  { %s77_s10 = sld [smem:[#allocation5]]  ;;  %s359_s12 = sld [smem:[#allocation2 + $0x2]]  ;;  %v575_v2 = vld [vmem:[%s835_s0 + $0x2] sm:$0x1] }
  0x36   :  { %s360_s13 = sld [smem:[#allocation2 + $0x80]]  ;;  %s556_s14 = sld [smem:[#allocation5 + $0x1]] }
  0x37   :  { %s362_s17 = sld [smem:[#allocation2 + $0x81]]  ;;  %s363_s18 = sld [smem:[#allocation2 + $0x82]] }
  0x38   :  { %s568_s21 = sld [smem:[#allocation2 + $0x100]]  ;;  %s570_s22 = sld [smem:[#allocation5 + $0x2]] }
  0x39   :  { %s577_s25 = sld [smem:[#allocation2 + $0x101]]  ;;  %s579_s26 = sld [smem:[#allocation2 + $0x102]] }
  0x3a   :  { %v75_v3 = vstv %s74_s4  ;;  %s581_s2 = sld [smem:[#allocation2 + $0x180]]  ;;  %s583_s1 = sld [smem:[#allocation5 + $0x3]]  ;;  %v81_v6 = vstv %s358_s11 }
  0x3b   :  { %v78_v4 = vstv %s77_s10  ;;  %v76_v5 = vmul.f32 %v75_v3, %v561_v0  ;;  %v85_v7 = vstv %s359_s12  ;;  %s586_s27 = sld [smem:[#allocation2 + $0x181]]  ;;  %s588_s28 = sld [smem:[#allocation2 + $0x182]]  ;;  %v82_v8 = vmul.f32 %v566_v1, %v81_v6 }
  0x3c   :  { %v86_v9 = vmul.f32 %v575_v2, %v85_v7  ;;  %v90_v10 = vstv %s360_s13  ;;  %v93_v11 = vstv %s556_s14  ;;  %s593_s0 = sld [smem:[#allocation2 + $0x200]]  ;;  %s595_s29 = sld [smem:[#allocation5 + $0x4]] }
  0x3d   :  { %v79_v12 = vadd.f32 %v78_v4, %v76_v5  ;;  %v91_v13 = vmul.f32 %v90_v10, %v561_v0  ;;  %v96_v14 = vstv %s362_s17  ;;  %v100_v15 = vstv %s363_s18  ;;  %s598_s30 = sld [smem:[#allocation2 + $0x201]]  ;;  %s600_s6 = sld [smem:[#allocation2 + $0x202]] }
  0x3e   :  { %v97_v16 = vmul.f32 %v566_v1, %v96_v14  ;;  %v101_v17 = vmul.f32 %v575_v2, %v100_v15  ;;  %v105_v18 = vstv %s568_s21  ;;  %v108_v19 = vstv %s570_s22  ;;  %s606_s7 = sld [smem:[#allocation2 + $0x280]]  ;;  %s610_s8 = sld [smem:[#allocation5 + $0x5]] }
  0x3f   :  { %v83_v20 = vadd.f32 %v82_v8, %v79_v12  ;;  %v94_v21 = vadd.f32 %v93_v11, %v91_v13  ;;  %v106_v22 = vmul.f32 %v105_v18, %v561_v0  ;;  %v111_v23 = vstv %s577_s25  ;;  %s612_s9 = sld [smem:[#allocation2 + $0x281]]  ;;  %s618_s3 = sld [smem:[#allocation2 + $0x282]] }
  0x40   :  { %v112_v24 = vmul.f32 %v566_v1, %v111_v23  ;;  %v115_v25 = vstv %s579_s26  ;;  %v120_v26 = vstv %s581_s2  ;;  %v123_v27 = vstv %s583_s1  ;;  %s621_s4 = sld [smem:[#allocation2 + $0x300]]  ;;  %s623_s10 = sld [smem:[#allocation2 + $0x301]] }
  0x41   :  { %v87_v28 = vadd.f32 %v86_v9, %v83_v20  ;;  %v98_v29 = vadd.f32 %v97_v16, %v94_v21  ;;  %v109_v30 = vadd.f32 %v108_v19, %v106_v22  ;;  %v116_v31 = vmul.f32 %v575_v2, %v115_v25  ;;  %s629_s11 = sld [smem:[#allocation5 + $0x6]]  ;;  %s632_s12 = sld [smem:[#allocation2 + $0x302]] }
  0x42   :  { %v121_v32 = vmul.f32 %v120_v26, %v561_v0  ;;  %v126_v33 = vstv %s586_s27  ;;  %v130_v34 = vstv %s588_s28  ;;  %v135_v35 = vstv %s593_s0  ;;  %s634_s13 = sld [smem:[#allocation2 + $0x380]]  ;;  %s639_s14 = sld [smem:[#allocation5 + $0x7]] }
  0x43   :  { %v102_v36 = vadd.f32 %v101_v17, %v98_v29  ;;  %v113_v37 = vadd.f32 %v112_v24, %v109_v30  ;;  %v127_v38 = vmul.f32 %v566_v1, %v126_v33  ;;  %v131_v40 = vmul.f32 %v575_v2, %v130_v34  ;;  %s645_s15 = sld [smem:[#allocation2 + $0x381]]  ;;  %s647_s16 = sld [smem:[#allocation2 + $0x382]] }
  0x44   :  { %v124_v39 = vadd.f32 %v123_v27, %v121_v32  ;;  %v136_v41 = vmul.f32 %v135_v35, %v561_v0  ;;  %v138_v42 = vstv %s595_s29  ;;  %v641_v43 = vmax.f32 %v87_v28, 0.0  ;;  %s652_s17 = sld [smem:[#allocation7]]  ;;  %s660_s19 = sld [smem:[#allocation7 + $0x1]] }
  0x45   :  { %v117_v44 = vadd.f32 %v116_v31, %v113_v37  ;;  %v141_v45 = vstv %s598_s30  ;;  %v145_v46 = vstv %s600_s6  ;;  %v649_v47 = vmax.f32 %v102_v36, 0.0  ;;  %s658_s18 = sld [smem:[#allocation8]]  ;;  %s664_s20 = sld [smem:[#allocation7 + $0x2]] }
  0x46   :  { %v128_v48 = vadd.f32 %v127_v38, %v124_v39  ;;  %v139_v49 = vadd.f32 %v138_v42, %v136_v41  ;;  %v142_v50 = vmul.f32 %v566_v1, %v141_v45  ;;  %v146_v51 = vmul.f32 %v575_v2, %v145_v46  ;;  %s671_s21 = sld [smem:[#allocation7 + $0x3]]  ;;  %s673_s22 = sld [smem:[#allocation7 + $0x4]] }
  0x47   :  { %v150_v52 = vstv %s606_s7  ;;  %v153_v53 = vstv %s610_s8  ;;  %v156_v54 = vstv %s612_s9  ;;  %v666_v59 = vmax.f32 %v117_v44, 0.0  ;;  %s683_s23 = sld [smem:[#allocation7 + $0x5]]  ;;  %s687_s24 = sld [smem:[#allocation7 + $0x6]] }
  0x48   :  { %v132_v55 = vadd.f32 %v131_v40, %v128_v48  ;;  %v143_v56 = vadd.f32 %v142_v50, %v139_v49  ;;  %v151_v57 = vmul.f32 %v150_v52, %v561_v0  ;;  %v157_v58 = vmul.f32 %v566_v1, %v156_v54  ;;  %s689_s25 = sld [smem:[#allocation7 + $0x80]]  ;;  %s694_s26 = sld [smem:[#allocation8 + $0x1]] }
  0x49   :  { %v160_v60 = vstv %s618_s3  ;;  %v165_v61 = vstv %s621_s4  ;;  %v171_v62 = vstv %s623_s10  ;;  %v168_v5 = vstv %s629_s11  ;;  %s696_s2 = sld [smem:[#allocation7 + $0x81]]  ;;  %s700_s1 = sld [smem:[#allocation7 + $0x7]] }
  0x4a   :  { %v675_v63 = vmax.f32 %v132_v55, 0.0  ;;  %v154_v3 = vadd.f32 %v153_v53, %v151_v57  ;;  %v161_v4 = vmul.f32 %v575_v2, %v160_v60  ;;  %v166_v6 = vmul.f32 %v165_v61, %v561_v0  ;;  %s702_s27 = sld [smem:[#allocation7 + $0x82]]  ;;  %s707_s28 = sld [smem:[#allocation7 + $0x83]] }
  0x4b   :  { %v172_v7 = vmul.f32 %v566_v1, %v171_v62  ;;  %v175_v8 = vstv %s632_s12  ;;  %v180_v9 = vstv %s634_s13  ;;  %v147_v10 = vadd.f32 %v146_v51, %v143_v56  ;;  %s709_s0 = sld [smem:[#allocation7 + $0x84]]  ;;  %s715_s29 = sld [smem:[#allocation7 + $0x85]] }
  0x4c   :  { %v158_v11 = vadd.f32 %v157_v58, %v154_v3  ;;  %v176_v12 = vmul.f32 %v575_v2, %v175_v8  ;;  %v181_v13 = vmul.f32 %v180_v9, %v561_v0  ;;  %v169_v14 = vadd.f32 %v168_v5, %v166_v6  ;;  %s720_s30 = sld [smem:[#allocation7 + $0x86]]  ;;  %s722_s6 = sld [smem:[#allocation7 + $0x87]] }
  0x4d   :  { %v183_v15 = vstv %s639_s14  ;;  %v186_v16 = vstv %s645_s15  ;;  %v190_v17 = vstv %s647_s16  ;;  %v195_v22 = vstv %s652_s17  ;;  %s725_s7 = sld [smem:[#allocation7 + $0x100]]  ;;  %s727_s8 = sld [smem:[#allocation8 + $0x2]] }
  0x4e   :  { %v162_v18 = vadd.f32 %v161_v4, %v158_v11  ;;  %v184_v19 = vadd.f32 %v183_v15, %v181_v13  ;;  %v187_v20 = vmul.f32 %v566_v1, %v186_v16  ;;  %v191_v0 = vmul.f32 %v575_v2, %v190_v17  ;;  %s734_s9 = sld [smem:[#allocation7 + $0x101]]  ;;  %s736_s3 = sld [smem:[#allocation7 + $0x102]] }
  0x4f   :  { %v173_v21 = vadd.f32 %v172_v7, %v169_v14  ;;  %v198_v23 = vstv %s658_s18  ;;  %v201_v24 = vstv %s660_s19  ;;  %v711_v25 = vmax.f32 %v147_v10, 0.0  ;;  %s746_s4 = sld [smem:[#allocation7 + $0x103]]  ;;  %s748_s10 = sld [smem:[#allocation7 + $0x104]] }
  0x50   :  { %v188_v1 = vadd.f32 %v187_v20, %v184_v19  ;;  %v196_v26 = vmul.f32 %v195_v22, %v641_v43  ;;  %v202_v2 = vmul.f32 %v201_v24, %v649_v47  ;;  %v205_v28 = vstv %s664_s20  ;;  %s757_s11 = sld [smem:[#allocation7 + $0x105]]  ;;  %s761_s12 = sld [smem:[#allocation7 + $0x106]] }
  0x51   :  { %v177_v27 = vadd.f32 %v176_v12, %v173_v21  ;;  %v209_v29 = vstv %s671_s21  ;;  %v213_v30 = vstv %s673_s22  ;;  %v206_v33 = vmul.f32 %v205_v28, %v666_v59  ;;  %s763_s13 = sld [smem:[#allocation7 + $0x180]]  ;;  %s769_s14 = sld [smem:[#allocation8 + $0x3]] }
  0x52   :  { %v192_v31 = vadd.f32 %v191_v0, %v188_v1  ;;  %v199_v32 = vadd.f32 %v198_v23, %v196_v26  ;;  %v729_v34 = vmax.f32 %v162_v18, 0.0  ;;  %v210_v36 = vmul.f32 %v209_v29, %v675_v63  ;;  %s771_s15 = sld [smem:[#allocation7 + $0x181]]  ;;  %s779_s16 = sld [smem:[#allocation7 + $0x182]] }
  0x53   :  { %v731_v35 = vmax.f32 %v177_v27, 0.0  ;;  %v214_v38 = vmul.f32 %v213_v30, %v711_v25  ;;  %v217_v39 = vstv %s683_s23  ;;  %v221_v40 = vstv %s687_s24  ;;  %s781_s17 = sld [smem:[#allocation7 + $0x183]]  ;;  %s788_s18 = sld [smem:[#allocation7 + $0x107]] }
  0x54   :  { %v203_v37 = vadd.f32 %v202_v2, %v199_v32  ;;  %v741_v41 = vmax.f32 %v192_v31, 0.0  ;;  %v230_v42 = vstv %s689_s25  ;;  %v233_v44 = vstv %s694_s26  ;;  %s790_s19 = sld [smem:[#allocation7 + $0x184]]  ;;  %s797_s20 = sld [smem:[#allocation7 + $0x185]] }
  0x55   :  { %v236_v45 = vstv %s696_s2  ;;  %v225_v48 = vstv %s700_s1  ;;  %v231_v49 = vmul.f32 %v230_v42, %v641_v43  ;;  %v218_v51 = vmul.f32 %v217_v39, %v729_v34  ;;  %s804_s21 = sld [smem:[#allocation7 + $0x186]]  ;;  %s421_s22 = sld [smem:[#allocation7 + $0x187]] }
  0x56   :  { %v207_v46 = vadd.f32 %v206_v33, %v203_v37  ;;  %v237_v50 = vmul.f32 %v236_v45, %v649_v47  ;;  %v240_v52 = vstv %s702_s27  ;;  %v244_v53 = vstv %s707_s28  ;;  %s511_s23 = smov [#allocation10]  }
  0x57   :  { %v248_v54 = vstv %s709_s0  ;;  %v222_v56 = vmul.f32 %v221_v40, %v731_v35  ;;  %v234_v57 = vadd.f32 %v233_v44, %v231_v49  ;;  %v241_v58 = vmul.f32 %v240_v52, %v666_v59  ;;  %s342_s24 = sshll.u32 %s511_s23, 4  ;;  %s343_s24 = int_to_ptr.vmem [resolvable:$true] %s342_s24 }
  0x58   :  { %v211_v55 = vadd.f32 %v210_v36, %v207_v46  ;;  %v226_v60 = vmul.f32 %v225_v48, %v741_v41  ;;  %v245_v61 = vmul.f32 %v244_v53, %v675_v63  ;;  %v249_v62 = vmul.f32 %v248_v54, %v711_v25  ;;  %s477_s25 = scalar_lea.vmem %s343_s24, 64  ;;  %p482_p7 = scmp.lt.s32.totalorder %s343_s24, %s343_s24 }
  0x59   :  { %v252_v3 = vstv %s715_s29  ;;  %v238_v5 = vadd.f32 %v237_v50, %v234_v57  ;;  %v256_v6 = vstv %s720_s30  ;;  %v260_v7 = vstv %s722_s6  ;;  %p478_p6 = scmp.ne.s32.totalorder %s343_s24, %s477_s25  ;;  %p483_p8 = scmp.lt.s32.totalorder %s477_s25, %s477_s25 }
  0x5a   :  { %v215_v4 = vadd.f32 %v214_v38, %v211_v55  ;;  %v266_v8 = vstv %s725_s7  ;;  %v269_v9 = vstv %s727_s8  ;;  %v272_v10 = vstv %s734_s9 }
  0x5b   :  { %v276_v11 = vstv %s736_s3  ;;  %v242_v13 = vadd.f32 %v241_v58, %v238_v5  ;;  %v267_v14 = vmul.f32 %v266_v8, %v641_v43  ;;  %v273_v15 = vmul.f32 %v272_v10, %v649_v47  ;;  %p484_p9 = por %p483_p8, %p482_p7 }
  0x5c   :  { %v219_v12 = vadd.f32 %v218_v51, %v215_v4  ;;  %v253_v16 = vmul.f32 %v252_v3, %v729_v34  ;;  %v280_v17 = vstv %s746_s4  ;;  %v284_v18 = vstv %s748_s10 }
  0x5d   :  { %v246_v20 = vadd.f32 %v245_v61, %v242_v13  ;;  %v270_v0 = vadd.f32 %v269_v9, %v267_v14  ;;  %v277_v21 = vmul.f32 %v276_v11, %v666_v59  ;;  %v257_v22 = vmul.f32 %v256_v6, %v731_v35  ;;  %p485_p10 = pnand %p484_p9, %p478_p6 }
  0x5e   :  { %v223_v19 = vadd.f32 %v222_v56, %v219_v12  ;;  %v261_v23 = vmul.f32 %v260_v7, %v741_v41  ;;  %v281_v24 = vmul.f32 %v280_v17, %v675_v63  ;;  %v288_v1 = vstv %s757_s11 }
  0x5f   :  { %v250_v2 = vadd.f32 %v249_v62, %v246_v20  ;;  %v274_v27 = vadd.f32 %v273_v15, %v270_v0  ;;  %v285_v28 = vmul.f32 %v284_v18, %v711_v25  ;;  %v292_v29 = vstv %s761_s12 }
  0x60   :  { %v227_v26 = vadd.f32 %v226_v60, %v223_v19  ;;  %v302_v30 = vstv %s763_s13  ;;  %v305_v31 = vstv %s769_s14  ;;  %v308_v32 = vstv %s771_s15 }
  0x61   :  { %v254_v33 = vadd.f32 %v253_v16, %v250_v2  ;;  %v278_v36 = vadd.f32 %v277_v21, %v274_v27  ;;  %v303_v37 = vmul.f32 %v302_v30, %v641_v43  ;;  %v309_v38 = vmul.f32 %v308_v32, %v649_v47 }
  0x62   :  { %228 = vst [vmem:[#allocation10] sm:$0x1] %v227_v26  ;;  %v289_v39 = vmul.f32 %v288_v1, %v729_v34  ;;  %v312_v40 = vstv %s779_s16  ;;  %v316_v42 = vstv %s781_s17  ;;  %v293_v49 = vmul.f32 %v292_v29, %v731_v35 }
  0x63   :  { %v258_v44 = vadd.f32 %v257_v22, %v254_v33  ;;  %v282_v45 = vadd.f32 %v281_v24, %v278_v36  ;;  %v306_v46 = vadd.f32 %v305_v31, %v303_v37  ;;  %v313_v48 = vmul.f32 %v312_v40, %v666_v59 }
  0x64   :  { %v296_v50 = vstv %s788_s18  ;;  %v320_v51 = vstv %s790_s19  ;;  %v317_v47 = vmul.f32 %v316_v42, %v675_v63  ;;  %v324_v54 = vstv %s797_s20 }
  0x65   :  { %v262_v52 = vadd.f32 %v261_v23, %v258_v44  ;;  %v286_v43 = vadd.f32 %v285_v28, %v282_v45  ;;  %v310_v53 = vadd.f32 %v309_v38, %v306_v46  ;;  %v297_v56 = vmul.f32 %v296_v50, %v741_v41 }
  0x66   :  { %v321_v58 = vmul.f32 %v320_v51, %v711_v25  ;;  %v328_v60 = vstv %s804_s21  ;;  %v325_v62 = vmul.f32 %v324_v54, %v729_v34  ;;  %v332_v3 = vstv %s421_s22 }
  0x67   :  { %264 = vst [vmem:[#allocation10 + $0x1] sm:$0x1] %v262_v52  ;;  %v290_v55 = vadd.f32 %v289_v39, %v286_v43  ;;  %v314_v57 = vadd.f32 %v313_v48, %v310_v53  ;;  %v329_v6 = vmul.f32 %v328_v60, %v731_v35  ;;  %v333_v7 = vmul.f32 %v332_v3, %v741_v41 }
  0x69   :  { %v294_v61 = vadd.f32 %v293_v49, %v290_v55  ;;  %v318_v59 = vadd.f32 %v317_v47, %v314_v57 }
  0x6b   :  { %v298_v4 = vadd.f32 %v297_v56, %v294_v61  ;;  %v322_v5 = vadd.f32 %v321_v58, %v318_v59 }
  0x6d   :  { %300 = vst [vmem:[#allocation10 + $0x2] sm:$0x1] %v298_v4  ;;  %v326_v63 = vadd.f32 %v325_v62, %v322_v5 }
  0x6f   :  { %v330_v8 = vadd.f32 %v329_v6, %v326_v63 }
  0x71   :  { %v334_v9 = vadd.f32 %v333_v7, %v330_v8 }
  0x73   :  { %336 = vst [vmem:[#allocation10 + $0x3] sm:$0x1] %v334_v9 }
  0x74   :  { %488 = shalt.err (!%p485_p10)
}
  0x75   :  { %s489_s1 = scalar_lea.hbm %s840_s5, 64 }
  0x76   :  { %p490_p11 = scmp.ne.s32.totalorder %s840_s5, %s489_s1  ;;  %p493_p12 = scmp.lt.u32.totalorder %s489_s1, %s840_s5 }
  0x78   :  { %p495_p13 = pnand %p493_p12, %p490_p11 }
  0x7a   :  { %498 = shalt.err (!%p495_p13)
}
  0x7b   :  { %s512_s30 = smov 16   ;;  %s513_s6 = smov 1  }
  0x7c   :  { %348 = dma.vmem_to_hbm [thread:$0]  %s343_s24, 64, %s840_s5, [#allocation3], %s512_s30, %s512_s30, %s513_s6  }
  0x7d   :  { %505 = dma.done.wait [#allocation3], 64  }
  0x7e   :  { %506 = vsyncadd [#allocation3], 4294967232 }
  0x7f   :  { %352 = vsyncpa [#allocation3], 1 }
  0x80   :  { %353 = vsyncpa [#allocation4], 1 }
  0x81   :  { %354 = vsyncpa [#allocation6], 1 }
  0x82   :  { %355 = vsyncpa [#allocation9], 1 }

</bundles_post_ra>
